<compile_context>
chip_gen: v6e
topology: v6e:2x2x1
jax: 0.10.0
libtpu: 0.0.40
codegen_flags: <defaults>
</compile_context>

<pallas_src>
import jax
import jax.numpy as jnp
from jax.experimental import pallas as pl
from jax.experimental.pallas import tpu as pltpu


def _round_up(x, m):
    return (x + m - 1) // m * m


def _choose_tile_n(n):
    """Pick an N (patch) tile: multiple of 8 dividing the sublane-padded N."""
    n8 = _round_up(n, 8)
    best = 8
    for tn in (512, 384, 256, 128, 64, 32, 16, 8):
        if n8 % tn == 0:
            best = tn
            break
    # For large N whose only exact divisors are small, prefer a 256-wide tile
    # and pad N instead (per-step overhead ~0.35us favors bigger tiles).
    if best < 128 and n8 > 256:
        return 256, _round_up(n8, 256)
    return best, n8


def _patch_embed_kernel(p_ref, w_ref, pos_ref, o_ref):
    # p_ref:   (1, TN, K)   bf16 patch tile for (batch b, patch-tile n)
    # w_ref:   (K, Ep)      bf16 projection weight (grid-invariant)
    # pos_ref: (1, TN, Ep)  f32 positional embedding with Conv3d bias folded in
    # o_ref:   (1, TN, Ep)  f32 output tile
    acc = jnp.dot(p_ref[0], w_ref[...], preferred_element_type=jnp.float32)
    o_ref[0] = (acc + pos_ref[0]).astype(o_ref.dtype)


def patch_embedding_3d(x, weight, bias, pos_embed, patch_size,
                       *, mxu_dtype=jnp.bfloat16, tile_n=None):
    """Forward pass of PatchEmbedding3D (Conv3d stride==kernel==patch + pos add).

    x:         (B, C, D, H, W)     NCDHW, like the PyTorch Conv3d input
    weight:    (E, C, pD, pH, pW)  PyTorch Conv3d weight layout
    bias:      (E,)
    pos_embed: (1, N, E)
    returns:   (B, N, E) float32
    """
    B, C, D, H, W = x.shape
    pD, pH, pW = patch_size
    E = weight.shape[0]
    Gd, Gh, Gw = D // pD, H // pH, W // pW
    N = Gd * Gh * Gw
    K = C * pD * pH * pW

    # --- glue: extract non-overlapping patches in (C, pD, pH, pW) order -----
    # Cast to the MXU dtype *before* the transpose so the materialized patch
    # matrix costs half the HBM bytes.
    # TODO(synk): fuse this patch extraction into the kernel pipeline (strided
    # index_maps over the raw NCDHW input) to avoid one (B, N, K) HBM copy.
    xm = x.astype(mxu_dtype)
    xp = xm.reshape(B, C, Gd, pD, Gh, pH, Gw, pW)
    xp = jnp.transpose(xp, (0, 2, 4, 6, 1, 3, 5, 7))   # (B,Gd,Gh,Gw,C,pD,pH,pW)
    patches = xp.reshape(B, N, K)

    # Conv3d(stride==kernel==patch)  ≡  patches @ W_flat.T + bias
    w_mat = weight.reshape(E, K).T.astype(mxu_dtype)               # (K, E)
    # Fold the bias into the positional embedding (saves one VPU add / elem
    # and one input buffer pair).
    pos_b = (pos_embed + bias[None, None, :]).astype(jnp.float32)  # (1, N, E)

    # --- pad E to a lane-dense multiple of 128 (unmasked stores) ------------
    Ep = _round_up(E, 128)
    if Ep != E:
        w_mat = jnp.pad(w_mat, ((0, 0), (0, Ep - E)))
        pos_b = jnp.pad(pos_b, ((0, 0), (0, 0), (0, Ep - E)))

    # --- tile the patch axis -------------------------------------------------
    if tile_n is None:
        TN, N_pad = _choose_tile_n(N)
    else:
        TN = tile_n
        N_pad = _round_up(N, TN)
    assert TN % 8 == 0 or TN == N_pad, "N tile must be a multiple of 8"
    if N_pad != N:
        patches = jnp.pad(patches, ((0, 0), (0, N_pad - N), (0, 0)))
        pos_b = jnp.pad(pos_b, ((0, 0), (0, N_pad - N), (0, 0)))

    # --- VMEM budget: per-step residency * headroom, capped at 64 MiB (v7x) --
    mxu_bytes = jnp.dtype(mxu_dtype).itemsize
    est = (2 * TN * K * mxu_bytes        # patch tile, double-buffered
           + 2 * TN * Ep * 4             # pos tile, double-buffered
           + 2 * TN * Ep * 4             # output tile, double-buffered
           + 2 * K * Ep * mxu_bytes)     # weight (worst case double-buffered)
    vmem_limit = int(min(64 * 2**20, max(2 * est, 32 * 2**20)))

    grid = (B, N_pad // TN)

    def make_call(single_buffer_weight):
        w_spec = None
        if single_buffer_weight and hasattr(pl, "Buffered"):
            try:
                # Weight never changes across the grid -> one resident buffer.
                w_spec = pl.BlockSpec((K, Ep), lambda b, n: (0, 0),
                                      pipeline_mode=pl.Buffered(1))
            except Exception:
                w_spec = None
        if w_spec is None:
            w_spec = pl.BlockSpec((K, Ep), lambda b, n: (0, 0))
        return pl.pallas_call(
            _patch_embed_kernel,
            out_shape=jax.ShapeDtypeStruct((B, N_pad, Ep), jnp.float32),
            grid_spec=pltpu.PrefetchScalarGridSpec(
                num_scalar_prefetch=0,
                grid=grid,
                in_specs=[
                    pl.BlockSpec((1, TN, K), lambda b, n: (b, n, 0)),
                    w_spec,
                    pl.BlockSpec((1, TN, Ep), lambda b, n: (0, n, 0)),
                ],
                out_specs=pl.BlockSpec((1, TN, Ep), lambda b, n: (b, n, 0)),
            ),
            compiler_params=pltpu.CompilerParams(
                dimension_semantics=("parallel", "parallel"),
                vmem_limit_bytes=vmem_limit),
        )

    try:
        out = make_call(True)(patches, w_mat, pos_b)
    except Exception:
        # Fallback in case single-buffering (pl.Buffered(1)) is unsupported.
        out = make_call(False)(patches, w_mat, pos_b)

    if N_pad != N or Ep != E:
        out = out[:, :N, :E]
    return out


if __name__ == "__main__":
    # Small config consistent with the module:
    #   in_channels=4, patch_size=(4,4,2), img_size=(16,16,8), embed_dim=32
    #   -> grid_size=(4,4,4), num_patches=64, K = 4*4*4*2 = 128
    B = 2
    C = 4
    patch_size = (4, 4, 2)
    img_size = (16, 16, 8)
    E = 32
    pD, pH, pW = patch_size
    Gd, Gh, Gw = (img_size[0] // pD, img_size[1] // pH, img_size[2] // pW)
    N = Gd * Gh * Gw
    K = C * pD * pH * pW

    key = jax.random.PRNGKey(0)
    kx, kw, kb, kp = jax.random.split(key, 4)

    x = jax.random.normal(kx, (B, C, *img_size), dtype=jnp.float32)
    bound = 1.0 / (K ** 0.5)
    weight = jax.random.uniform(kw, (E, C, pD, pH, pW),
                                minval=-bound, maxval=bound, dtype=jnp.float32)
    bias = jax.random.uniform(kb, (E,), minval=-bound, maxval=bound,
                              dtype=jnp.float32)
    pos_embed = (jax.random.truncated_normal(kp, -2.0, 2.0, (1, N, E),
                                             dtype=jnp.float32) * 0.02)

    # tile_n=16 so the small test exercises multiple patch tiles per batch.
    out = patch_embedding_3d(x, weight, bias, pos_embed, patch_size, tile_n=16)
    out = jax.block_until_ready(out)
    assert out.shape == (B, N, E)

    # --- reference with the same bf16 operand quantization ------------------
    xb = x.astype(jnp.bfloat16)
    xp = xb.reshape(B, C, Gd, pD, Gh, pH, Gw, pW)
    xp = jnp.transpose(xp, (0, 2, 4, 6, 1, 3, 5, 7)).reshape(B, N, K)
    wb = weight.reshape(E, K).astype(jnp.bfloat16)
    ref = jnp.einsum("bnk,ek->bne", xp, wb,
                     preferred_element_type=jnp.float32)
    ref = ref + bias[None, None, :] + pos_embed
    assert jnp.allclose(out, ref, atol=2e-3, rtol=2e-3)

    # --- sanity vs full-f32 math (loose tolerance for bf16 quantization) ----
    xp32 = x.reshape(B, C, Gd, pD, Gh, pH, Gw, pW)
    xp32 = jnp.transpose(xp32, (0, 2, 4, 6, 1, 3, 5, 7)).reshape(B, N, K)
    ref32 = (jnp.einsum("bnk,ek->bne", xp32, weight.reshape(E, K))
             + bias[None, None, :] + pos_embed)
    assert jnp.allclose(out, ref32, atol=5e-2, rtol=5e-2)

    print("KERNEL_OK")
</pallas_src>

<mosaic_0001>
module attributes {stable_mosaic.version = 11 : i64} {
  func.func @_patch_embed_kernel(%arg0: i32, %arg1: i32, %arg2: memref<1x16x128xbf16, #tpu.memory_space<vmem>>, %arg3: memref<128x128xbf16, #tpu.memory_space<vmem>>, %arg4: memref<1x16x128xf32, #tpu.memory_space<vmem>>, %arg5: memref<1x16x128xf32, #tpu.memory_space<vmem>>) attributes {dimension_semantics = [#tpu.dimension_semantics<parallel>, #tpu.dimension_semantics<parallel>], iteration_bounds = array<i64: 2, 4>, scalar_prefetch = 0 : i64, scratch_operands = 0 : i64, tpu.core_type = #tpu.core_type<tc>, window_params = [{transform_indices = @transform_0, window_bounds = array<i64: 1, 16, 128>}, {pipeline_mode = #tpu.pipeline_mode<synchronous>, transform_indices = @transform_1, window_bounds = array<i64: 128, 128>}, {transform_indices = @transform_2, window_bounds = array<i64: 1, 16, 128>}, {transform_indices = @transform_3, window_bounds = array<i64: 1, 16, 128>}]} {
    %c0 = arith.constant 0 : index
    %c0_0 = arith.constant 0 : index
    %c0_1 = arith.constant 0 : index
    %0 = vector.load %arg2[%c0, %c0_0, %c0_1] : memref<1x16x128xbf16, #tpu.memory_space<vmem>>, vector<1x16x128xbf16>
    %1 = vector.shape_cast %0 : vector<1x16x128xbf16> to vector<16x128xbf16>
    %c0_2 = arith.constant 0 : index
    %c0_3 = arith.constant 0 : index
    %2 = vector.load %arg3[%c0_2, %c0_3] : memref<128x128xbf16, #tpu.memory_space<vmem>>, vector<128x128xbf16>
    %cst = arith.constant dense<0.000000e+00> : vector<16x128xf32>
    %3 = tpu.matmul %1, %2, %cst {dimension_numbers = #tpu.dot_dimension_numbers<[1], [0], [0], [1], [0, 0, 1, 1], [], []>} : vector<16x128xbf16>, vector<128x128xbf16>, vector<16x128xf32> -> vector<16x128xf32>
    %c0_4 = arith.constant 0 : index
    %c0_5 = arith.constant 0 : index
    %c0_6 = arith.constant 0 : index
    %4 = vector.load %arg4[%c0_4, %c0_5, %c0_6] : memref<1x16x128xf32, #tpu.memory_space<vmem>>, vector<1x16x128xf32>
    %5 = vector.shape_cast %4 : vector<1x16x128xf32> to vector<16x128xf32>
    %6 = arith.addf %3, %5 : vector<16x128xf32>
    %c0_7 = arith.constant 0 : index
    %c0_8 = arith.constant 0 : index
    %c0_9 = arith.constant 0 : index
    %7 = vector.load %arg5[%c0_7, %c0_8, %c0_9] : memref<1x16x128xf32, #tpu.memory_space<vmem>>, vector<1x16x128xf32>
    %8 = vector.shape_cast %7 : vector<1x16x128xf32> to vector<16x128xf32>
    %9 = vector.shape_cast %6 : vector<16x128xf32> to vector<1x16x128xf32>
    tpu.vector_store %arg5[%c0_7, %c0_8, %c0_9], %9 {strides = array<i32>} : memref<1x16x128xf32, #tpu.memory_space<vmem>>, vector<1x16x128xf32>,
    return
  }
  func.func @transform_0(%arg0: i32, %arg1: i32) -> (i32, i32, i32) {
    %c0_i32 = arith.constant 0 : i32
    %c0_i32_0 = arith.constant 0 : i32
    return %arg0, %arg1, %c0_i32 : i32, i32, i32
  }
  func.func @transform_1(%arg0: i32, %arg1: i32) -> (i32, i32) {
    %c0_i32 = arith.constant 0 : i32
    %c0_i32_0 = arith.constant 0 : i32
    %c0_i32_1 = arith.constant 0 : i32
    return %c0_i32, %c0_i32_0 : i32, i32
  }
  func.func @transform_2(%arg0: i32, %arg1: i32) -> (i32, i32, i32) {
    %c0_i32 = arith.constant 0 : i32
    %c0_i32_0 = arith.constant 0 : i32
    %c0_i32_1 = arith.constant 0 : i32
    return %c0_i32, %arg1, %c0_i32_0 : i32, i32, i32
  }
  func.func @transform_3(%arg0: i32, %arg1: i32) -> (i32, i32, i32) {
    %c0_i32 = arith.constant 0 : i32
    %c0_i32_0 = arith.constant 0 : i32
    return %arg0, %arg1, %c0_i32 : i32, i32, i32
  }
}

module attributes {stable_mosaic.version = 11 : i64} {
  func.func @_patch_embed_kernel(%arg0: i32, %arg1: i32, %arg2: memref<1x16x128xbf16, #tpu.memory_space<vmem>>, %arg3: memref<128x128xbf16, #tpu.memory_space<vmem>>, %arg4: memref<1x16x128xf32, #tpu.memory_space<vmem>>, %arg5: memref<1x16x128xf32, #tpu.memory_space<vmem>>) attributes {dimension_semantics = [#tpu.dimension_semantics<parallel>, #tpu.dimension_semantics<parallel>], iteration_bounds = array<i64: 2, 4>, scalar_prefetch = 0 : i64, scratch_operands = 0 : i64, tpu.core_type = #tpu.core_type<tc>, window_params = [{transform_indices = @transform_0, window_bounds = array<i64: 1, 16, 128>}, {pipeline_mode = #tpu.pipeline_mode<synchronous>, transform_indices = @transform_1, window_bounds = array<i64: 128, 128>}, {transform_indices = @transform_2, window_bounds = array<i64: 1, 16, 128>}, {transform_indices = @transform_3, window_bounds = array<i64: 1, 16, 128>}]} {
    %c0 = arith.constant 0 : index
    %c0_0 = arith.constant 0 : index
    %c0_1 = arith.constant 0 : index
    %0 = vector.load %arg2[%c0, %c0_0, %c0_1] : memref<1x16x128xbf16, #tpu.memory_space<vmem>>, vector<1x16x128xbf16>
    %1 = vector.shape_cast %0 : vector<1x16x128xbf16> to vector<16x128xbf16>
    %c0_2 = arith.constant 0 : index
    %c0_3 = arith.constant 0 : index
    %2 = vector.load %arg3[%c0_2, %c0_3] : memref<128x128xbf16, #tpu.memory_space<vmem>>, vector<128x128xbf16>
    %cst = arith.constant dense<0.000000e+00> : vector<16x128xf32>
    %3 = tpu.matmul %1, %2, %cst {dimension_numbers = #tpu.dot_dimension_numbers<[1], [0], [0], [1], [0, 0, 1, 1], [], []>} : vector<16x128xbf16>, vector<128x128xbf16>, vector<16x128xf32> -> vector<16x128xf32>
    %c0_4 = arith.constant 0 : index
    %c0_5 = arith.constant 0 : index
    %c0_6 = arith.constant 0 : index
    %4 = vector.load %arg4[%c0_4, %c0_5, %c0_6] : memref<1x16x128xf32, #tpu.memory_space<vmem>>, vector<1x16x128xf32>
    %5 = vector.shape_cast %4 : vector<1x16x128xf32> to vector<16x128xf32>
    %6 = arith.addf %3, %5 : vector<16x128xf32>
    %c0_7 = arith.constant 0 : index
    %c0_8 = arith.constant 0 : index
    %c0_9 = arith.constant 0 : index
    %7 = vector.load %arg5[%c0_7, %c0_8, %c0_9] : memref<1x16x128xf32, #tpu.memory_space<vmem>>, vector<1x16x128xf32>
    %8 = vector.shape_cast %7 : vector<1x16x128xf32> to vector<16x128xf32>
    %9 = vector.shape_cast %6 : vector<16x128xf32> to vector<1x16x128xf32>
    tpu.vector_store %arg5[%c0_7, %c0_8, %c0_9], %9 {strides = array<i32>} : memref<1x16x128xf32, #tpu.memory_space<vmem>>, vector<1x16x128xf32>,
    return
  }
  func.func @transform_0(%arg0: i32, %arg1: i32) -> (i32, i32, i32) {
    %c0_i32 = arith.constant 0 : i32
    %c0_i32_0 = arith.constant 0 : i32
    return %arg0, %arg1, %c0_i32 : i32, i32, i32
  }
  func.func @transform_1(%arg0: i32, %arg1: i32) -> (i32, i32) {
    %c0_i32 = arith.constant 0 : i32
    %c0_i32_0 = arith.constant 0 : i32
    %c0_i32_1 = arith.constant 0 : i32
    return %c0_i32, %c0_i32_0 : i32, i32
  }
  func.func @transform_2(%arg0: i32, %arg1: i32) -> (i32, i32, i32) {
    %c0_i32 = arith.constant 0 : i32
    %c0_i32_0 = arith.constant 0 : i32
    %c0_i32_1 = arith.constant 0 : i32
    return %c0_i32, %arg1, %c0_i32_0 : i32, i32, i32
  }
  func.func @transform_3(%arg0: i32, %arg1: i32) -> (i32, i32, i32) {
    %c0_i32 = arith.constant 0 : i32
    %c0_i32_0 = arith.constant 0 : i32
    return %arg0, %arg1, %c0_i32 : i32, i32, i32
  }
}

</mosaic_0001>

<bundles_post_ra>
// kernel: tpu_custom_call.1
= control target key start
LH: loop header
LB: loop body
LE: loop exit
PB: predicated region body
PF: predicated region fallthrough
CT: control target
= control target key end

     0   :  { %s1258_s0 = inlined_call_operand.hbm [shape: bf16[2,64,128], index: 0, kind: input, shape index: {}]   ;;  %s1259_s1 = inlined_call_operand.hbm [shape: bf16[128,128], index: 1, kind: input, shape index: {}]   ;;  %s1260_s2 = inlined_call_operand.hbm [shape: f32[1,64,128], index: 2, kind: input, shape index: {}]   ;;  %s1261_s3 = inlined_call_operand.hbm [shape: f32[2,64,128], index: 3, kind: output, shape index: {}]  }
   0x1   :  { %1273 = sst [smem:[#allocation20_spill]] %s1258_s0 }
   0x2   :  { %1274 = sst [smem:[#allocation21_spill]] %s1261_s3 }
   0x3   :  { %8 = vsyncpa [#allocation3], 0 }
   0x4   :  { %10 = vsyncpa [#allocation3 + $0x1], 0 }
   0x5   :  { %11 = vsyncpa [#allocation6], 0 }
   0x6   :  { %12 = vsyncpa [#allocation4], 0 }
   0x7   :  { %14 = vsyncpa [#allocation4 + $0x1], 0  ;;  %s957_s12 = smov 0   ;;  %s959_s13 = smov 0  }
   0x8   :  { %s961_s14 = smov 0   ;;  %s963_s15 = smov 0  }
   0x9   :  { %s965_s16 = smov 0   ;;  %s967_s17 = smov 0  }
   0xa   :  { %s969_s18 = smov 0   ;;  %s971_s19 = smov 0  }
   0xb   :  { %s973_s20 = smov 0   ;;  %s975_s21 = smov 0  }
   0xc   :  { %s977_s22 = smov 0  }
   0xd LB: > { %1275 = sst [smem:[#allocation13_spill]] %s903_s17  ;;  %s29_s23 = sadd.s32 1, %s915_s20  ;;  %s923_s22 = sphi %s977_s22, %s20_s22   ;;  %s919_s21 = sphi %s975_s21, %s1316_s21   ;;  %s915_s20 = sphi %s973_s20, %s1315_s20   ;;  %s911_s19 = sphi %s971_s19, %s1306_s19   ;;  %s907_s18 = sphi %s969_s18, %s1314_s18   ;;  %s903_s17 = sphi %s967_s17, %s1305_s17   ;;  %s899_s16 = sphi %s965_s16, %s1313_s16   ;;  %s895_s15 = sphi %s963_s15, %s1312_s15   ;;  %s891_s14 = sphi %s961_s14, %s1311_s14   ;;  %s887_s13 = sphi %s959_s13, %s1310_s13   ;;  %s883_s12 = sphi %s957_s12, %s1309_s12  }
   0xe   : > { %1276 = sst [smem:[#allocation14_spill]] %s907_s18  ;;  %s32_s24 = sadd.s32 1, %s919_s21 }
   0xf   : > { %1277 = sst [smem:[#allocation15_spill]] %s911_s19  ;;  %p30_p0 = scmp.ge.s32.totalorder %s29_s23, 4 }
  0x10   : > { %1278 = sst [smem:[#allocation16_spill]] %s919_s21  ;;  %s41_s25 = sadd.s32 1, %s903_s17 }
  0x11   : > { %p48_p1 = scmp.ne.s32.totalorder %s903_s17, %s899_s16  ;;  %p1265_p2 = scmp.eq.s32.totalorder %s923_s22, 0 }
  0x12   : > { %s1318_s23 = smov (%p30_p0, %s29_s23), 0  ;;  %s1320_s24 = smov (!%p30_p0, %s32_s24), %s919_s21 }
  0x13   : > { %1279 = sst [smem:[#allocation17_spill]] %s1318_s23  ;;  %s1023_s26 = ssub.s32 %s915_s20, %s1318_s23 }
  0x14   : > { %p1030_p3 = por %p1265_p2, %p48_p1  ;;  %p34_p4 = scmp.ge.s32.totalorder %s1320_s24, 2 }
  0x15   : > { %p86_p5 = scmp.eq.s32.totalorder %s1023_s26, 0  ;;  %p1264_p6 = scmp.lt.s32.totalorder %s923_s22, 8 }
  0x16   : > { %s1322_s24 = smov (%p34_p4, %s1320_s24), 0  ;;  %s166_s29 = sand.u32 1, %s923_s22  }
  0x17   : > { %1281 = sst [smem:[#allocation18_spill]] %s1322_s24  ;;  %s36_s28 = ssub.s32 %s919_s21, %s1322_s24 }
  0x18   : > { %s38_s30 = sor.u32 %s1023_s26, %s36_s28  ;;  %s168_s4 = sand.u32 1, %s903_s17  }
  0x19   : > { %p39_p7 = scmp.eq.s32.totalorder %s38_s30, 0  ;;  %s521_s5 = sshll.u32 %s168_s4, 3 }
  0x1a   : > { %s522_s6 = sshll.u32 %s915_s20, 1  ;;  %s523_s8 = sshll.u32 %s919_s21, 3 }
  0x1b   : > { %s1045_s7 = scalar_select %p39_p7, %s903_s17, %s41_s25  }
  0x1c   : > { %s176_s9 = sadd.s32 %s523_s8, %s522_s6  ;;  %s170_s10 = scalar_lea.vmem [#allocation2], %s521_s5 }
  0x1d   : > { %1282 = sst [smem:[#allocation19_spill]] %s1045_s7  ;;  %s179_s11 = sshll.u32 %s170_s10, 4  ;;  %s180_s11 = int_to_ptr.vmem [resolvable:$true] %s179_s11 }
  0x1e   : > { %s524_s23 = sshll.u32 %s176_s9, 6  ;;  %s1283_s0 = sld [smem:[#allocation20_spill]] }
  0x1f   : > { %p1055_p8 = pnand %p1264_p6, %p1030_p3  ;;  %s1059_s30 = scalar_lea.sflag [#allocation3], %s166_s29 }
  0x20   : > { %s726_s25 = scalar_lea.vmem %s180_s11, 128  ;;  %s925_s4 = smov [#allocation2]  }
  0x21   : > { %p715_p9 = pneg %p1055_p8  ;;  %p727_p10 = scmp.ne.s32.totalorder %s180_s11, %s726_s25 }
  0x22   : > { %s731_s5 = sshll.u32 %s925_s4, 4  ;;  %s732_s5 = int_to_ptr.vmem [resolvable:$false] %s731_s5 }
  0x23   : > { %p729_p11 = pnand %p727_p10, %p715_p9  ;;  %s733_s3 = scalar_lea.vmem %s732_s5, 256 }
  0x24   : > { %s178_s18 = scalar_lea.hbm %s1283_s0, %s524_s23  ;;  %p734_p13 = scmp.lt.s32.totalorder %s180_s11, %s732_s5 }
  0x25   : > { %p730_p12 = pneg %p729_p11  ;;  %p735_p0 = scmp.lt.s32.totalorder %s733_s3, %s726_s25 }
  0x27   : > { %p736_p4 = por %p735_p0, %p734_p13 }
  0x29   : > { %p737_p3 = pnand %p736_p4, %p730_p12 }
  0x2b   : > { %740 = shalt.err (!%p737_p3)
}
  0x2c   : > { %s926_s19 = smov 64   ;;  %s927_s23 = smov 4  }
  0x2d   : > { %595 = dma.hbm_to_vmem [thread:$0]  (!%p1055_p8), %s178_s18, 128, %s180_s11, %s1059_s30, %s926_s19, %s926_s19, %s927_s23  }
  0x2e   : > { %s1070_s27 = sadd.s32 4294967295, %s923_s22   ;;  %s517_s29 = sadd.s32 4294967294, %s923_s22  }
  0x2f   : > { %p54_p7 = scmp.ne.s32.totalorder %s899_s16, %s895_s15  ;;  %p1267_p9 = scmp.eq.s32.totalorder %s1070_s27, 0 }
  0x30   : > { %p101_p10 = scmp.ne.s32.totalorder %s887_s13, %s883_s12  ;;  %p127_p11 = scmp.eq.s32.totalorder %s1070_s27, 7 }
  0x31   : > { %p133_p12 = scmp.eq.s32.totalorder %s517_s29, 7  ;;  %p1081_p8 = por %p1267_p9, %p54_p7 }
  0x32   : > { %p1087_p13 = por %p101_p10, %p1267_p9  ;;  %p1094_p0 = por %p127_p11, %p48_p1 }
  0x33   : > { %s1285_s18 = scalar_select %p1081_p8, 1, 0 }
  0x34   : > { %s1286_s6 = scalar_select %p1087_p13, 1, 0 }
  0x35   : > { %s1287_s12 = scalar_select %p1094_p0, 1, 0 }
  0x36   : > { %p1098_p4 = por %p133_p12, %p54_p7  ;;  %p518_p3 = scmp.ge.s32.totalorder %s923_s22, 1 }
  0x37   : > { %p140_p6 = scmp.lt.s32.totalorder %s923_s22, 9  ;;  %s928_s10 = smov [#allocation5]  }
  0x38   : > { %s1288_s8 = scalar_select %p1098_p4, 1, 0 }
  0x39   : > { %p1104_p2 = pnand %p518_p3, %p140_p6  ;;  %s152_s11 = sshll.u32 %s928_s10, 4  ;;  %s153_s11 = int_to_ptr.vmem [resolvable:$true] %s152_s11 }
  0x3a   : > { %s88_s28 = sadd.s32 1, %s891_s14  ;;  %p95_p1 = scmp.ne.s32.totalorder %s891_s14, %s887_s13 }
  0x3b   : > { %p588_p10 = pneg %p1104_p2  ;;  %s191_s4 = sand.u32 1, %s891_s14  }
  0x3c   : > { %s1123_s5 = scalar_select %p86_p5, %s891_s14, %s88_s28  }
  0x3d   : > { %p1115_p11 = pnand %p588_p10, %p1267_p9  ;;  %p1291_p6 = scmp.eq.s32.totalorder %s923_s22, 0 }
  0x3e   : > { %s752_s29 = scalar_lea.vmem %s153_s11, 1024  ;;  %p760_p10 = scmp.lt.s32.totalorder %s153_s11, %s153_s11 }
  0x3f   : > { %p1127_p7 = por %p95_p1, %p1291_p6  ;;  %p743_p12 = pneg %p1115_p11 }
  0x40   : > { %p753_p3 = scmp.ne.s32.totalorder %s153_s11, %s752_s29  ;;  %p761_p9 = scmp.lt.s32.totalorder %s752_s29, %s752_s29 }
  0x42   : > { %p755_p4 = pnand %p753_p3, %p743_p12  ;;  %p762_p13 = por %p761_p9, %p760_p10 }
  0x44   : > { %p756_p0 = pneg %p755_p4 }
  0x46   : > { %p763_p8 = pnand %p762_p13, %p756_p0 }
  0x48   : > { %766 = shalt.err (!%p763_p8)
}
  0x49   : > { %591 = dma.hbm_to_vmem [thread:$0]  (!%p1115_p11), %s1259_s1, 1024, %s153_s11, [#allocation6], %s926_s19, %s926_s19, %s927_s23  }
  0x4a   : > { %s525_s28 = sshll.u32 %s191_s4, 4  ;;  %s548_s0 = sshll.u32 %s915_s20, 8 }
  0x4b   : > { %s199_s29 = scalar_lea.hbm %s1260_s2, %s548_s0  ;;  %s193_s7 = scalar_lea.vmem [#allocation7], %s525_s28 }
  0x4c   : > { %s200_s17 = sshll.u32 %s193_s7, 4  ;;  %p1293_p5 = scmp.lt.s32.totalorder %s923_s22, 8  ;;  %s201_s17 = int_to_ptr.vmem [resolvable:$true] %s200_s17 }
  0x4d   : > { %s780_s26 = scalar_lea.vmem %s201_s17, 256  ;;  %s929_s19 = smov [#allocation7]  }
  0x4e   : > { %p1149_p9 = pnand %p1293_p5, %p1127_p7  ;;  %p781_p13 = scmp.ne.s32.totalorder %s201_s17, %s780_s26 }
  0x4f   : > { %s785_s23 = sshll.u32 %s929_s19, 4  ;;  %s786_s23 = int_to_ptr.vmem [resolvable:$false] %s785_s23 }
  0x50   : > { %p769_p8 = pneg %p1149_p9  ;;  %s787_s0 = scalar_lea.vmem %s786_s23, 512 }
  0x51   : > { %p788_p1 = scmp.lt.s32.totalorder %s201_s17, %s786_s23  ;;  %p789_p11 = scmp.lt.s32.totalorder %s787_s0, %s780_s26 }
  0x52   : > { %p783_p0 = pnand %p781_p13, %p769_p8 }
  0x53   : > { %p790_p6 = por %p789_p11, %p788_p1 }
  0x54   : > { %p784_p4 = pneg %p783_p0 }
  0x56   : > { %p791_p12 = pnand %p790_p6, %p784_p4 }
  0x58   : > { %794 = shalt.err (!%p791_p12)
}
  0x59   : > { %s930_s21 = smov 128   ;;  %s931_s24 = smov 8  }
  0x5a   : > { %598 = dma.hbm_to_vmem [thread:$0]  (!%p1149_p9), %s199_s29, 256, %s201_s17, %s1059_s30, %s930_s21, %s930_s21, %s931_s24  }
  0x5b   : > { %212 = sbr.rel (%p1104_p2) target bundleno = 350 (0x15e), region = 32  ;;  %s214_s7 = sand.u32 (!%p1104_p2), 1, %s1070_s27  }
  0x5c   : > { %s1162_s11 = sand.u32 (!%p1104_p2), 1, %s899_s16   ;;  %s215_s3 = scalar_lea.sflag (!%p1104_p2), [#allocation3], %s214_s7 }
  0x5d   : > { %s529_s4 = sshll.u32 (!%p1104_p2), %s1162_s11, 3  ;;  %p1295_p7 = scmp.ne.s32.totalorder (!%p1104_p2), %s1285_s18, 0 }
  0x5e   : > { %s1165_s10 = scalar_lea.vmem (!%p1104_p2), [#allocation2], %s529_s4 }
  0x60   : > { %866 = dma.done.wait (%p1295_p7), %s215_s3, 128  }
  0x61   : > { %868 = vsyncadd (%p1295_p7), %s215_s3, 4294967168  ;;  %p1296_p3 = scmp.eq.s32.totalorder %s1070_s27, 0 }
  0x63   : > { %870 = dma.done.wait (%p1296_p3), [#allocation6], 1024   ;;  %p1297_p2 = pmov %p1296_p3 }
  0x64   : > { %s229_s17 = sand.u32 1, %s887_s13   ;;  %p1298_p10 = scmp.ne.s32.totalorder %s1286_s6, 0 }
  0x65   : > { %872 = vsyncadd (%p1297_p2), [#allocation6], 4294966272  ;;  %s1176_s30 = sshll.u32 %s229_s17, 4 }
  0x66   : > { %s231_s9 = scalar_lea.vmem [#allocation7], %s1176_s30 }
  0x67   : > { %874 = dma.done.wait (%p1298_p10), %s215_s3, 256  }
  0x68   : > { %876 = vsyncadd (%p1298_p10), %s215_s3, 4294967040  ;;  %v932_v0 = vmov 0.0   ;;  %vm933_vm0 = vmmov 0   ;;  %v704_v1 = vld [vmem:[#allocation5 + $0x38] sm:$0xff]   ;;  %v705_v2 = vld [vmem:[#allocation5 + $0x30] sm:$0xff]   ;;  %s1299_s27 = sld [smem:[#allocation14_spill]] }
  0x69   : > { %558 = vmatprep.subr.bf16.mxu0 %v932_v0  ;;  %574 = vmatprep.mubr.msk.bf16.mxu0 %vm933_vm0, %v932_v0  ;;  %v706_v3 = vld [vmem:[#allocation5 + $0x28] sm:$0xff]   ;;  %v707_v4 = vld [vmem:[#allocation5 + $0x20] sm:$0xff]   ;;  %s1300_s18 = sld [smem:[#allocation15_spill]]  ;;  %v708_v5 = vld [vmem:[#allocation5 + $0x18] sm:$0xff]   ;;  %s532_s29 = sshll.u32 %s1162_s11, 4 }
  0x6a   : > { %559 = vmatpush3.bf16.msra.mxu0 %v704_v1  ;;  %v709_v6 = vld [vmem:[#allocation5 + $0x10] sm:$0xff]   ;;  %v710_v7 = vld [vmem:[#allocation5 + $0x8] sm:$0xff]   ;;  %v711_v8 = vld [vmem:[#allocation5] sm:$0xff]   ;;  %s258_s26 = scalar_lea.vmem [#allocation8], %s532_s29  ;;  %s1301_s24 = sld [smem:[#allocation21_spill]] }
  0x6b   : > { %560 = vmatprep.subr.bf16.mxu0 %v932_v0  ;;  %v712_v9 = vld [vmem:[%s1165_s10] sm:$0xff]   ;;  %v281_v10 = vld [vmem:[%s231_s9] sm:$0xff]  ;;  %s396_s19 = sshll.u32 %s258_s26, 4  ;;  %s381_s4 = scalar_lea.sflag [#allocation4], %s1162_s11  ;;  %s1191_s19 = int_to_ptr.vmem [resolvable:$true] %s396_s19 }
  0x6c   : > { %v282_v14 = vld [vmem:[%s231_s9 + $0x8] sm:$0xff]  ;;  %s795_s3 = scalar_lea.vmem %s1191_s19, 256  ;;  %p1302_p9 = scmp.ne.s32.totalorder %s1287_s12, 0 }
  0x6d   : > { %p796_p5 = scmp.ne.s32.totalorder %s1191_s19, %s795_s3  ;;  %s934_s10 = smov [#allocation8]  }
  0x6e   : > { %561 = vmatpush3.bf16.msra.mxu0 %v705_v2  ;;  %s543_s6 = sshll.u32 %s1299_s27, 1  ;;  %s799_s17 = sshll.u32 %s934_s10, 4  ;;  %s800_s17 = int_to_ptr.vmem [resolvable:$false] %s799_s17 }
  0x6f   : > { %562 = vmatprep.subr.bf16.mxu0 %v932_v0  ;;  %s544_s28 = sshll.u32 %s1300_s18, 3  ;;  %p797_p8 = pnand %p796_p5, %p1302_p9 }
  0x70   : > { %s393_s25 = sadd.s32 %s544_s28, %s543_s6  ;;  %s801_s30 = scalar_lea.vmem %s800_s17, 512 }
  0x71   : > { %s545_s23 = sshll.u32 %s393_s25, 7  ;;  %p798_p13 = pneg %p797_p8 }
  0x72   : > { %563 = vmatpush3.bf16.msra.mxu0 %v706_v3  ;;  %s1196_s7 = scalar_lea.hbm %s1301_s24, %s545_s23  ;;  %p802_p0 = scmp.lt.s32.totalorder %s1191_s19, %s800_s17 }
  0x73   : > { %564 = vmatprep.subr.bf16.mxu0 %v932_v0  ;;  %p803_p4 = scmp.lt.s32.totalorder %s801_s30, %s795_s3 }
  0x75   : > { %p804_p1 = por %p803_p4, %p802_p0 }
  0x76   : > { %565 = vmatpush3.bf16.msra.mxu0 %v707_v4 }
  0x77   : > { %566 = vmatprep.subr.bf16.mxu0 %v932_v0  ;;  %p805_p11 = pnand %p804_p1, %p798_p13 }
  0x7a   : > { %567 = vmatpush3.bf16.msra.mxu0 %v708_v5 }
  0x7b   : > { %568 = vmatprep.subr.bf16.mxu0 %v932_v0 }
  0x7e   : > { %569 = vmatpush3.bf16.msra.mxu0 %v709_v6 }
  0x7f   : > { %570 = vmatprep.subr.bf16.mxu0 %v932_v0 }
  0x82   : > { %571 = vmatpush3.bf16.msra.mxu0 %v710_v7 }
  0x83   : > { %572 = vmatprep.subr.bf16.mxu0 %v932_v0 }
  0x86   : > { %573 = vmatpush3.bf16.msra.mxu0 %v711_v8 }
  0x89   : > { %575 = vmatmul.mubr.bf16.vlgmr.msra.gmra.mxu0 %v712_v9 }
 0x149   : > { %v371_v11 = vpop.f32.mrf.mxu0 }
 0x14a   : > { %v372_v12 = vadd.f32 %v371_v11, %v281_v10 }
 0x14b   : > { %v576_v13 = vpop.f32.mrf.mxu0 }
 0x14c   : > { %378 = vst [vmem:[%s258_s26] sm:$0xff] %v372_v12 }
 0x14d   : > { %v374_v15 = vpop.f32.mrf.mxu0 }
 0x14e   : > { %v375_v16 = vadd.f32 %v374_v15, %v282_v14 }
 0x14f   : > { %v577_v17 = vpop.f32.mrf.mxu0 }
 0x150   : > { %379 = vst [vmem:[%s258_s26 + $0x8] sm:$0xff] %v375_v16 }
 0x151   : > { %808 = shalt.err (!%p805_p11)
}
 0x152   : > { %s809_s9 = scalar_lea.hbm %s1196_s7, 256  ;;  %s813_s6 = scalar_lea.hbm %s1301_s24, 2048 }
 0x153   : > { %p810_p6 = scmp.ne.s32.totalorder %s1196_s7, %s809_s9  ;;  %p814_p3 = scmp.lt.s32.totalorder %s1196_s7, %s1301_s24 }
 0x154   : > { %p815_p2 = scmp.lt.s32.totalorder %s813_s6, %s809_s9 }
 0x155   : > { %p811_p12 = pnand %p810_p6, %p1302_p9 }
 0x156   : > { %p816_p10 = por %p815_p2, %p814_p3 }
 0x157   : > { %p812_p7 = pneg %p811_p12 }
 0x159   : > { %p817_p5 = pnand %p816_p10, %p812_p7 }
 0x15b   : > { %820 = shalt.err (!%p817_p5)
}
 0x15c   : > { %s935_s25 = smov 128   ;;  %s936_s26 = smov 8  }
 0x15d   : > { %586 = dma.vmem_to_hbm [thread:$0]  (%p1302_p9), %s1191_s19, 256, %s1196_s7, %s381_s4, %s935_s25, %s935_s25, %s936_s26  }
 0x15e PF: > { %p606_p8 = scmp.ge.s32.totalorder %s923_s22, 2  ;;  %s411_s23 = sand.u32 1, %s895_s15  }
 0x15f   : > { %p1303_p13 = scmp.ne.s32.totalorder %s1288_s8, 0  ;;  %s412_s0 = scalar_lea.sflag [#allocation4], %s411_s23 }
 0x161   : > { %p600_p0 = pnand %p606_p8, %p1303_p13 }
 0x163   : > { %p601_p4 = pneg %p600_p0 }
 0x165   : > { %878 = dma.done.wait (%p601_p4), %s412_s0, 256  }
 0x166   : > { %880 = vsyncadd (%p601_p4), %s412_s0, 4294967040  ;;  %s20_s22 = sadd.s32 1, %s923_s22   ;;  %s1304_s11 = sld [smem:[#allocation13_spill]] }
 0x167   : > { %p17_p1 = scmp.ge.s32.totalorder %s20_s22, 10   ;;  %s1305_s17 = sld [smem:[#allocation19_spill]] }
 0x168   : > { %s1306_s19 = sld [smem:[#allocation16_spill]]  ;;  %s1309_s12 = smov %s887_s13 }
 0x169   : > { %s1307_s21 = sld [smem:[#allocation17_spill]]  ;;  %s1310_s13 = smov %s891_s14 }
 0x16a   : > { %s1308_s7 = sld [smem:[#allocation18_spill]]  ;;  %s1311_s14 = smov %s1123_s5 }
 0x16b   : > { %s1312_s15 = smov %s899_s16  ;;  %s1314_s18 = smov %s915_s20 }
 0x16c   : > { %s1313_s16 = smov %s1304_s11  ;;  %19 = sbr.rel (!%p17_p1) target bundleno = 13 (0xd), region = 92 }
 0x16f   : > { %s1315_s20 = smov %s1307_s21 }
 0x170   : > { %s1316_s21 = smov %s1308_s7 }
 0x171   :  { %417 = vsyncpa [#allocation3], 1 }
 0x172   :  { %419 = vsyncpa [#allocation3 + $0x1], 1 }
 0x173   :  { %420 = vsyncpa [#allocation6], 1 }
 0x174   :  { %421 = vsyncpa [#allocation4], 1 }
 0x175   :  { %423 = vsyncpa [#allocation4 + $0x1], 1 }

// kernel: tpu_custom_call.1
= control target key start
LH: loop header
LB: loop body
LE: loop exit
PB: predicated region body
PF: predicated region fallthrough
CT: control target
= control target key end

     0   :  { %s1258_s0 = inlined_call_operand.hbm [shape: bf16[2,64,128], index: 0, kind: input, shape index: {}]   ;;  %s1259_s1 = inlined_call_operand.hbm [shape: bf16[128,128], index: 1, kind: input, shape index: {}]   ;;  %s1260_s2 = inlined_call_operand.hbm [shape: f32[1,64,128], index: 2, kind: input, shape index: {}]   ;;  %s1261_s3 = inlined_call_operand.hbm [shape: f32[2,64,128], index: 3, kind: output, shape index: {}]  }
   0x1   :  { %1273 = sst [smem:[#allocation20_spill]] %s1258_s0 }
   0x2   :  { %1274 = sst [smem:[#allocation21_spill]] %s1261_s3 }
   0x3   :  { %8 = vsyncpa [#allocation3], 0 }
   0x4   :  { %10 = vsyncpa [#allocation3 + $0x1], 0 }
   0x5   :  { %11 = vsyncpa [#allocation6], 0 }
   0x6   :  { %12 = vsyncpa [#allocation4], 0 }
   0x7   :  { %14 = vsyncpa [#allocation4 + $0x1], 0  ;;  %s957_s12 = smov 0   ;;  %s959_s13 = smov 0  }
   0x8   :  { %s961_s14 = smov 0   ;;  %s963_s15 = smov 0  }
   0x9   :  { %s965_s16 = smov 0   ;;  %s967_s17 = smov 0  }
   0xa   :  { %s969_s18 = smov 0   ;;  %s971_s19 = smov 0  }
   0xb   :  { %s973_s20 = smov 0   ;;  %s975_s21 = smov 0  }
   0xc   :  { %s977_s22 = smov 0  }
   0xd LB: > { %1275 = sst [smem:[#allocation13_spill]] %s903_s17  ;;  %s29_s23 = sadd.s32 1, %s915_s20  ;;  %s923_s22 = sphi %s977_s22, %s20_s22   ;;  %s919_s21 = sphi %s975_s21, %s1316_s21   ;;  %s915_s20 = sphi %s973_s20, %s1315_s20   ;;  %s911_s19 = sphi %s971_s19, %s1306_s19   ;;  %s907_s18 = sphi %s969_s18, %s1314_s18   ;;  %s903_s17 = sphi %s967_s17, %s1305_s17   ;;  %s899_s16 = sphi %s965_s16, %s1313_s16   ;;  %s895_s15 = sphi %s963_s15, %s1312_s15   ;;  %s891_s14 = sphi %s961_s14, %s1311_s14   ;;  %s887_s13 = sphi %s959_s13, %s1310_s13   ;;  %s883_s12 = sphi %s957_s12, %s1309_s12  }
   0xe   : > { %1276 = sst [smem:[#allocation14_spill]] %s907_s18  ;;  %s32_s24 = sadd.s32 1, %s919_s21 }
   0xf   : > { %1277 = sst [smem:[#allocation15_spill]] %s911_s19  ;;  %p30_p0 = scmp.ge.s32.totalorder %s29_s23, 4 }
  0x10   : > { %1278 = sst [smem:[#allocation16_spill]] %s919_s21  ;;  %s41_s25 = sadd.s32 1, %s903_s17 }
  0x11   : > { %p48_p1 = scmp.ne.s32.totalorder %s903_s17, %s899_s16  ;;  %p1265_p2 = scmp.eq.s32.totalorder %s923_s22, 0 }
  0x12   : > { %s1318_s23 = smov (%p30_p0, %s29_s23), 0  ;;  %s1320_s24 = smov (!%p30_p0, %s32_s24), %s919_s21 }
  0x13   : > { %1279 = sst [smem:[#allocation17_spill]] %s1318_s23  ;;  %s1023_s26 = ssub.s32 %s915_s20, %s1318_s23 }
  0x14   : > { %p1030_p3 = por %p1265_p2, %p48_p1  ;;  %p34_p4 = scmp.ge.s32.totalorder %s1320_s24, 2 }
  0x15   : > { %p86_p5 = scmp.eq.s32.totalorder %s1023_s26, 0  ;;  %p1264_p6 = scmp.lt.s32.totalorder %s923_s22, 8 }
  0x16   : > { %s1322_s24 = smov (%p34_p4, %s1320_s24), 0  ;;  %s166_s29 = sand.u32 1, %s923_s22  }
  0x17   : > { %1281 = sst [smem:[#allocation18_spill]] %s1322_s24  ;;  %s36_s28 = ssub.s32 %s919_s21, %s1322_s24 }
  0x18   : > { %s38_s30 = sor.u32 %s1023_s26, %s36_s28  ;;  %s168_s4 = sand.u32 1, %s903_s17  }
  0x19   : > { %p39_p7 = scmp.eq.s32.totalorder %s38_s30, 0  ;;  %s521_s5 = sshll.u32 %s168_s4, 3 }
  0x1a   : > { %s522_s6 = sshll.u32 %s915_s20, 1  ;;  %s523_s8 = sshll.u32 %s919_s21, 3 }
  0x1b   : > { %s1045_s7 = scalar_select %p39_p7, %s903_s17, %s41_s25  }
  0x1c   : > { %s176_s9 = sadd.s32 %s523_s8, %s522_s6  ;;  %s170_s10 = scalar_lea.vmem [#allocation2], %s521_s5 }
  0x1d   : > { %1282 = sst [smem:[#allocation19_spill]] %s1045_s7  ;;  %s179_s11 = sshll.u32 %s170_s10, 4  ;;  %s180_s11 = int_to_ptr.vmem [resolvable:$true] %s179_s11 }
  0x1e   : > { %s524_s23 = sshll.u32 %s176_s9, 6  ;;  %s1283_s0 = sld [smem:[#allocation20_spill]] }
  0x1f   : > { %p1055_p8 = pnand %p1264_p6, %p1030_p3  ;;  %s1059_s30 = scalar_lea.sflag [#allocation3], %s166_s29 }
  0x20   : > { %s726_s25 = scalar_lea.vmem %s180_s11, 128  ;;  %s925_s4 = smov [#allocation2]  }
  0x21   : > { %p715_p9 = pneg %p1055_p8  ;;  %p727_p10 = scmp.ne.s32.totalorder %s180_s11, %s726_s25 }
  0x22   : > { %s731_s5 = sshll.u32 %s925_s4, 4  ;;  %s732_s5 = int_to_ptr.vmem [resolvable:$false] %s731_s5 }
  0x23   : > { %p729_p11 = pnand %p727_p10, %p715_p9  ;;  %s733_s3 = scalar_lea.vmem %s732_s5, 256 }
  0x24   : > { %s178_s18 = scalar_lea.hbm %s1283_s0, %s524_s23  ;;  %p734_p13 = scmp.lt.s32.totalorder %s180_s11, %s732_s5 }
  0x25   : > { %p730_p12 = pneg %p729_p11  ;;  %p735_p0 = scmp.lt.s32.totalorder %s733_s3, %s726_s25 }
  0x27   : > { %p736_p4 = por %p735_p0, %p734_p13 }
  0x29   : > { %p737_p3 = pnand %p736_p4, %p730_p12 }
  0x2b   : > { %740 = shalt.err (!%p737_p3)
}
  0x2c   : > { %s926_s19 = smov 64   ;;  %s927_s23 = smov 4  }
  0x2d   : > { %595 = dma.hbm_to_vmem [thread:$0]  (!%p1055_p8), %s178_s18, 128, %s180_s11, %s1059_s30, %s926_s19, %s926_s19, %s927_s23  }
  0x2e   : > { %s1070_s27 = sadd.s32 4294967295, %s923_s22   ;;  %s517_s29 = sadd.s32 4294967294, %s923_s22  }
  0x2f   : > { %p54_p7 = scmp.ne.s32.totalorder %s899_s16, %s895_s15  ;;  %p1267_p9 = scmp.eq.s32.totalorder %s1070_s27, 0 }
  0x30   : > { %p101_p10 = scmp.ne.s32.totalorder %s887_s13, %s883_s12  ;;  %p127_p11 = scmp.eq.s32.totalorder %s1070_s27, 7 }
  0x31   : > { %p133_p12 = scmp.eq.s32.totalorder %s517_s29, 7  ;;  %p1081_p8 = por %p1267_p9, %p54_p7 }
  0x32   : > { %p1087_p13 = por %p101_p10, %p1267_p9  ;;  %p1094_p0 = por %p127_p11, %p48_p1 }
  0x33   : > { %s1285_s18 = scalar_select %p1081_p8, 1, 0 }
  0x34   : > { %s1286_s6 = scalar_select %p1087_p13, 1, 0 }
  0x35   : > { %s1287_s12 = scalar_select %p1094_p0, 1, 0 }
  0x36   : > { %p1098_p4 = por %p133_p12, %p54_p7  ;;  %p518_p3 = scmp.ge.s32.totalorder %s923_s22, 1 }
  0x37   : > { %p140_p6 = scmp.lt.s32.totalorder %s923_s22, 9  ;;  %s928_s10 = smov [#allocation5]  }
  0x38   : > { %s1288_s8 = scalar_select %p1098_p4, 1, 0 }
  0x39   : > { %p1104_p2 = pnand %p518_p3, %p140_p6  ;;  %s152_s11 = sshll.u32 %s928_s10, 4  ;;  %s153_s11 = int_to_ptr.vmem [resolvable:$true] %s152_s11 }
  0x3a   : > { %s88_s28 = sadd.s32 1, %s891_s14  ;;  %p95_p1 = scmp.ne.s32.totalorder %s891_s14, %s887_s13 }
  0x3b   : > { %p588_p10 = pneg %p1104_p2  ;;  %s191_s4 = sand.u32 1, %s891_s14  }
  0x3c   : > { %s1123_s5 = scalar_select %p86_p5, %s891_s14, %s88_s28  }
  0x3d   : > { %p1115_p11 = pnand %p588_p10, %p1267_p9  ;;  %p1291_p6 = scmp.eq.s32.totalorder %s923_s22, 0 }
  0x3e   : > { %s752_s29 = scalar_lea.vmem %s153_s11, 1024  ;;  %p760_p10 = scmp.lt.s32.totalorder %s153_s11, %s153_s11 }
  0x3f   : > { %p1127_p7 = por %p95_p1, %p1291_p6  ;;  %p743_p12 = pneg %p1115_p11 }
  0x40   : > { %p753_p3 = scmp.ne.s32.totalorder %s153_s11, %s752_s29  ;;  %p761_p9 = scmp.lt.s32.totalorder %s752_s29, %s752_s29 }
  0x42   : > { %p755_p4 = pnand %p753_p3, %p743_p12  ;;  %p762_p13 = por %p761_p9, %p760_p10 }
  0x44   : > { %p756_p0 = pneg %p755_p4 }
  0x46   : > { %p763_p8 = pnand %p762_p13, %p756_p0 }
  0x48   : > { %766 = shalt.err (!%p763_p8)
}
  0x49   : > { %591 = dma.hbm_to_vmem [thread:$0]  (!%p1115_p11), %s1259_s1, 1024, %s153_s11, [#allocation6], %s926_s19, %s926_s19, %s927_s23  }
  0x4a   : > { %s525_s28 = sshll.u32 %s191_s4, 4  ;;  %s548_s0 = sshll.u32 %s915_s20, 8 }
  0x4b   : > { %s199_s29 = scalar_lea.hbm %s1260_s2, %s548_s0  ;;  %s193_s7 = scalar_lea.vmem [#allocation7], %s525_s28 }
  0x4c   : > { %s200_s17 = sshll.u32 %s193_s7, 4  ;;  %p1293_p5 = scmp.lt.s32.totalorder %s923_s22, 8  ;;  %s201_s17 = int_to_ptr.vmem [resolvable:$true] %s200_s17 }
  0x4d   : > { %s780_s26 = scalar_lea.vmem %s201_s17, 256  ;;  %s929_s19 = smov [#allocation7]  }
  0x4e   : > { %p1149_p9 = pnand %p1293_p5, %p1127_p7  ;;  %p781_p13 = scmp.ne.s32.totalorder %s201_s17, %s780_s26 }
  0x4f   : > { %s785_s23 = sshll.u32 %s929_s19, 4  ;;  %s786_s23 = int_to_ptr.vmem [resolvable:$false] %s785_s23 }
  0x50   : > { %p769_p8 = pneg %p1149_p9  ;;  %s787_s0 = scalar_lea.vmem %s786_s23, 512 }
  0x51   : > { %p788_p1 = scmp.lt.s32.totalorder %s201_s17, %s786_s23  ;;  %p789_p11 = scmp.lt.s32.totalorder %s787_s0, %s780_s26 }
  0x52   : > { %p783_p0 = pnand %p781_p13, %p769_p8 }
  0x53   : > { %p790_p6 = por %p789_p11, %p788_p1 }
  0x54   : > { %p784_p4 = pneg %p783_p0 }
  0x56   : > { %p791_p12 = pnand %p790_p6, %p784_p4 }
  0x58   : > { %794 = shalt.err (!%p791_p12)
}
  0x59   : > { %s930_s21 = smov 128   ;;  %s931_s24 = smov 8  }
  0x5a   : > { %598 = dma.hbm_to_vmem [thread:$0]  (!%p1149_p9), %s199_s29, 256, %s201_s17, %s1059_s30, %s930_s21, %s930_s21, %s931_s24  }
  0x5b   : > { %212 = sbr.rel (%p1104_p2) target bundleno = 350 (0x15e), region = 32  ;;  %s214_s7 = sand.u32 (!%p1104_p2), 1, %s1070_s27  }
  0x5c   : > { %s1162_s11 = sand.u32 (!%p1104_p2), 1, %s899_s16   ;;  %s215_s3 = scalar_lea.sflag (!%p1104_p2), [#allocation3], %s214_s7 }
  0x5d   : > { %s529_s4 = sshll.u32 (!%p1104_p2), %s1162_s11, 3  ;;  %p1295_p7 = scmp.ne.s32.totalorder (!%p1104_p2), %s1285_s18, 0 }
  0x5e   : > { %s1165_s10 = scalar_lea.vmem (!%p1104_p2), [#allocation2], %s529_s4 }
  0x60   : > { %866 = dma.done.wait (%p1295_p7), %s215_s3, 128  }
  0x61   : > { %868 = vsyncadd (%p1295_p7), %s215_s3, 4294967168  ;;  %p1296_p3 = scmp.eq.s32.totalorder %s1070_s27, 0 }
  0x63   : > { %870 = dma.done.wait (%p1296_p3), [#allocation6], 1024   ;;  %p1297_p2 = pmov %p1296_p3 }
  0x64   : > { %s229_s17 = sand.u32 1, %s887_s13   ;;  %p1298_p10 = scmp.ne.s32.totalorder %s1286_s6, 0 }
  0x65   : > { %872 = vsyncadd (%p1297_p2), [#allocation6], 4294966272  ;;  %s1176_s30 = sshll.u32 %s229_s17, 4 }
  0x66   : > { %s231_s9 = scalar_lea.vmem [#allocation7], %s1176_s30 }
  0x67   : > { %874 = dma.done.wait (%p1298_p10), %s215_s3, 256  }
  0x68   : > { %876 = vsyncadd (%p1298_p10), %s215_s3, 4294967040  ;;  %v932_v0 = vmov 0.0   ;;  %vm933_vm0 = vmmov 0   ;;  %v704_v1 = vld [vmem:[#allocation5 + $0x38] sm:$0xff]   ;;  %v705_v2 = vld [vmem:[#allocation5 + $0x30] sm:$0xff]   ;;  %s1299_s27 = sld [smem:[#allocation14_spill]] }
  0x69   : > { %558 = vmatprep.subr.bf16.mxu0 %v932_v0  ;;  %574 = vmatprep.mubr.msk.bf16.mxu0 %vm933_vm0, %v932_v0  ;;  %v706_v3 = vld [vmem:[#allocation5 + $0x28] sm:$0xff]   ;;  %v707_v4 = vld [vmem:[#allocation5 + $0x20] sm:$0xff]   ;;  %s1300_s18 = sld [smem:[#allocation15_spill]]  ;;  %v708_v5 = vld [vmem:[#allocation5 + $0x18] sm:$0xff]   ;;  %s532_s29 = sshll.u32 %s1162_s11, 4 }
  0x6a   : > { %559 = vmatpush3.bf16.msra.mxu0 %v704_v1  ;;  %v709_v6 = vld [vmem:[#allocation5 + $0x10] sm:$0xff]   ;;  %v710_v7 = vld [vmem:[#allocation5 + $0x8] sm:$0xff]   ;;  %v711_v8 = vld [vmem:[#allocation5] sm:$0xff]   ;;  %s258_s26 = scalar_lea.vmem [#allocation8], %s532_s29  ;;  %s1301_s24 = sld [smem:[#allocation21_spill]] }
  0x6b   : > { %560 = vmatprep.subr.bf16.mxu0 %v932_v0  ;;  %v712_v9 = vld [vmem:[%s1165_s10] sm:$0xff]   ;;  %v281_v10 = vld [vmem:[%s231_s9] sm:$0xff]  ;;  %s396_s19 = sshll.u32 %s258_s26, 4  ;;  %s381_s4 = scalar_lea.sflag [#allocation4], %s1162_s11  ;;  %s1191_s19 = int_to_ptr.vmem [resolvable:$true] %s396_s19 }
  0x6c   : > { %v282_v14 = vld [vmem:[%s231_s9 + $0x8] sm:$0xff]  ;;  %s795_s3 = scalar_lea.vmem %s1191_s19, 256  ;;  %p1302_p9 = scmp.ne.s32.totalorder %s1287_s12, 0 }
  0x6d   : > { %p796_p5 = scmp.ne.s32.totalorder %s1191_s19, %s795_s3  ;;  %s934_s10 = smov [#allocation8]  }
  0x6e   : > { %561 = vmatpush3.bf16.msra.mxu0 %v705_v2  ;;  %s543_s6 = sshll.u32 %s1299_s27, 1  ;;  %s799_s17 = sshll.u32 %s934_s10, 4  ;;  %s800_s17 = int_to_ptr.vmem [resolvable:$false] %s799_s17 }
  0x6f   : > { %562 = vmatprep.subr.bf16.mxu0 %v932_v0  ;;  %s544_s28 = sshll.u32 %s1300_s18, 3  ;;  %p797_p8 = pnand %p796_p5, %p1302_p9 }
  0x70   : > { %s393_s25 = sadd.s32 %s544_s28, %s543_s6  ;;  %s801_s30 = scalar_lea.vmem %s800_s17, 512 }
  0x71   : > { %s545_s23 = sshll.u32 %s393_s25, 7  ;;  %p798_p13 = pneg %p797_p8 }
  0x72   : > { %563 = vmatpush3.bf16.msra.mxu0 %v706_v3  ;;  %s1196_s7 = scalar_lea.hbm %s1301_s24, %s545_s23  ;;  %p802_p0 = scmp.lt.s32.totalorder %s1191_s19, %s800_s17 }
  0x73   : > { %564 = vmatprep.subr.bf16.mxu0 %v932_v0  ;;  %p803_p4 = scmp.lt.s32.totalorder %s801_s30, %s795_s3 }
  0x75   : > { %p804_p1 = por %p803_p4, %p802_p0 }
  0x76   : > { %565 = vmatpush3.bf16.msra.mxu0 %v707_v4 }
  0x77   : > { %566 = vmatprep.subr.bf16.mxu0 %v932_v0  ;;  %p805_p11 = pnand %p804_p1, %p798_p13 }
  0x7a   : > { %567 = vmatpush3.bf16.msra.mxu0 %v708_v5 }
  0x7b   : > { %568 = vmatprep.subr.bf16.mxu0 %v932_v0 }
  0x7e   : > { %569 = vmatpush3.bf16.msra.mxu0 %v709_v6 }
  0x7f   : > { %570 = vmatprep.subr.bf16.mxu0 %v932_v0 }
  0x82   : > { %571 = vmatpush3.bf16.msra.mxu0 %v710_v7 }
  0x83   : > { %572 = vmatprep.subr.bf16.mxu0 %v932_v0 }
  0x86   : > { %573 = vmatpush3.bf16.msra.mxu0 %v711_v8 }
  0x89   : > { %575 = vmatmul.mubr.bf16.vlgmr.msra.gmra.mxu0 %v712_v9 }
 0x149   : > { %v371_v11 = vpop.f32.mrf.mxu0 }
 0x14a   : > { %v372_v12 = vadd.f32 %v371_v11, %v281_v10 }
 0x14b   : > { %v576_v13 = vpop.f32.mrf.mxu0 }
 0x14c   : > { %378 = vst [vmem:[%s258_s26] sm:$0xff] %v372_v12 }
 0x14d   : > { %v374_v15 = vpop.f32.mrf.mxu0 }
 0x14e   : > { %v375_v16 = vadd.f32 %v374_v15, %v282_v14 }
 0x14f   : > { %v577_v17 = vpop.f32.mrf.mxu0 }
 0x150   : > { %379 = vst [vmem:[%s258_s26 + $0x8] sm:$0xff] %v375_v16 }
 0x151   : > { %808 = shalt.err (!%p805_p11)
}
 0x152   : > { %s809_s9 = scalar_lea.hbm %s1196_s7, 256  ;;  %s813_s6 = scalar_lea.hbm %s1301_s24, 2048 }
 0x153   : > { %p810_p6 = scmp.ne.s32.totalorder %s1196_s7, %s809_s9  ;;  %p814_p3 = scmp.lt.s32.totalorder %s1196_s7, %s1301_s24 }
 0x154   : > { %p815_p2 = scmp.lt.s32.totalorder %s813_s6, %s809_s9 }
 0x155   : > { %p811_p12 = pnand %p810_p6, %p1302_p9 }
 0x156   : > { %p816_p10 = por %p815_p2, %p814_p3 }
 0x157   : > { %p812_p7 = pneg %p811_p12 }
 0x159   : > { %p817_p5 = pnand %p816_p10, %p812_p7 }
 0x15b   : > { %820 = shalt.err (!%p817_p5)
}
 0x15c   : > { %s935_s25 = smov 128   ;;  %s936_s26 = smov 8  }
 0x15d   : > { %586 = dma.vmem_to_hbm [thread:$0]  (%p1302_p9), %s1191_s19, 256, %s1196_s7, %s381_s4, %s935_s25, %s935_s25, %s936_s26  }
 0x15e PF: > { %p606_p8 = scmp.ge.s32.totalorder %s923_s22, 2  ;;  %s411_s23 = sand.u32 1, %s895_s15  }
 0x15f   : > { %p1303_p13 = scmp.ne.s32.totalorder %s1288_s8, 0  ;;  %s412_s0 = scalar_lea.sflag [#allocation4], %s411_s23 }
 0x161   : > { %p600_p0 = pnand %p606_p8, %p1303_p13 }
 0x163   : > { %p601_p4 = pneg %p600_p0 }
 0x165   : > { %878 = dma.done.wait (%p601_p4), %s412_s0, 256  }
 0x166   : > { %880 = vsyncadd (%p601_p4), %s412_s0, 4294967040  ;;  %s20_s22 = sadd.s32 1, %s923_s22   ;;  %s1304_s11 = sld [smem:[#allocation13_spill]] }
 0x167   : > { %p17_p1 = scmp.ge.s32.totalorder %s20_s22, 10   ;;  %s1305_s17 = sld [smem:[#allocation19_spill]] }
 0x168   : > { %s1306_s19 = sld [smem:[#allocation16_spill]]  ;;  %s1309_s12 = smov %s887_s13 }
 0x169   : > { %s1307_s21 = sld [smem:[#allocation17_spill]]  ;;  %s1310_s13 = smov %s891_s14 }
 0x16a   : > { %s1308_s7 = sld [smem:[#allocation18_spill]]  ;;  %s1311_s14 = smov %s1123_s5 }
 0x16b   : > { %s1312_s15 = smov %s899_s16  ;;  %s1314_s18 = smov %s915_s20 }
 0x16c   : > { %s1313_s16 = smov %s1304_s11  ;;  %19 = sbr.rel (!%p17_p1) target bundleno = 13 (0xd), region = 92 }
 0x16f   : > { %s1315_s20 = smov %s1307_s21 }
 0x170   : > { %s1316_s21 = smov %s1308_s7 }
 0x171   :  { %417 = vsyncpa [#allocation3], 1 }
 0x172   :  { %419 = vsyncpa [#allocation3 + $0x1], 1 }
 0x173   :  { %420 = vsyncpa [#allocation6], 1 }
 0x174   :  { %421 = vsyncpa [#allocation4], 1 }
 0x175   :  { %423 = vsyncpa [#allocation4 + $0x1], 1 }

</bundles_post_ra>
